<compile_context>
chip_gen: v7x
topology: tpu7x:2x2x1
jax: 0.10.0
libtpu: 0.0.40
codegen_flags: <defaults>
</compile_context>

<pallas_src>
import jax
import jax.numpy as jnp
from jax.experimental import pallas as pl
from jax.experimental.pallas import tpu as pltpu


def _patch_linear_kernel(x_ref, w_ref, b_ref, o_ref):
    # x_ref: (1, K, T) VMEM   w_ref: (K,) SMEM   b_ref: (1,) SMEM   o_ref: (1, 1, T) VMEM
    K = x_ref.shape[1]
    acc = x_ref[:, 0, :] * w_ref[0]          # (1, T) f32 on the VPU
    for k in range(1, K):                    # K is tiny (C*p*p); fully unrolled
        acc = acc + x_ref[:, k, :] * w_ref[k]
    o_ref[:, 0, :] = acc + b_ref[0]


def _round_up_to_128(x):
    return pl.cdiv(x, 128) * 128


def dummy_forward(x, w, b, patch_size=1, tile_l=65536):
    """x: (N, C, H, W) f32, w: (1, C, p, p) f32, b: (1,) f32 -> (N, 1, H/p, W/p)."""
    N, C, H, W = x.shape
    p = patch_size
    assert H % p == 0 and W % p == 0
    Ho, Wo = H // p, W // p
    K = C * p * p

    if p == 1:
        # Free reshape: per-image slab (C, H*W); no HBM repack, no pad.
        xv = x.reshape(N, C, H * W)                    # (B, K, L)
        wk = w.reshape(C)
    else:
        # TODO(synk): express this gather via strided in-kernel slices instead of
        # a wrapper transpose (extra HBM pass) for patch_size > 1.
        xv = (
            x.reshape(N, C, Ho, p, Wo, p)
            .transpose(1, 3, 5, 0, 2, 4)               # (c, di, dj, n, io, jo)
            .reshape(1, K, N * Ho * Wo)
        )
        wk = w.reshape(K)

    B, _, L = xv.shape
    bb = b.reshape(1)

    # Large lane tile (multiple of 128), clamped so a single tile covers small L.
    # VMEM per step (K=3, f32, tl=64K): ~0.75 MiB in + 0.25 MiB out, x2 buffers
    # -> ~2 MiB, comfortably inside the default scoped-VMEM limit on all chips.
    tl = min(int(tile_l), int(_round_up_to_128(L)))
    grid = (B, pl.cdiv(L, tl))

    out = pl.pallas_call(
        _patch_linear_kernel,
        out_shape=jax.ShapeDtypeStruct((B, 1, L), x.dtype),
        grid_spec=pltpu.PrefetchScalarGridSpec(
            num_scalar_prefetch=0,
            grid=grid,
            in_specs=[
                pl.BlockSpec((1, K, tl), lambda bi, ti: (bi, 0, ti)),
                pl.BlockSpec(memory_space=pltpu.MemorySpace.SMEM),   # weights
                pl.BlockSpec(memory_space=pltpu.MemorySpace.SMEM),   # bias
            ],
            out_specs=pl.BlockSpec((1, 1, tl), lambda bi, ti: (bi, 0, ti)),
        ),
        compiler_params=pltpu.CompilerParams(
            dimension_semantics=("parallel", "parallel"),
        ),
    )(xv, wk, bb)

    if p == 1:
        return out.reshape(N, 1, H, W)
    # p > 1: lane order was (n, io, jo)
    return out.reshape(N, Ho, Wo)[:, None, :, :]


def _conv_ref(x, w, b, p):
    """Plain-JAX reference for a stride-p, kernel-p, pad-0 conv (any out-channels)."""
    N, C, H, W = x.shape
    Ho, Wo = H // p, W // p
    xr = x.reshape(N, C, Ho, p, Wo, p)                  # n c i a j b
    out = jnp.einsum("nciajb,ocab->noij", xr, w)
    return out + b.reshape(1, -1, 1, 1)


if __name__ == "__main__":
    key = jax.random.PRNGKey(0)
    kx, kw, kb, kw2, kb2 = jax.random.split(key, 5)

    # Module spec: Conv2d(3, 1, kernel_size=patch_size, stride=patch_size), default p=1.
    N, C, H, W = 2, 3, 16, 16
    x = jax.random.normal(kx, (N, C, H, W), dtype=jnp.float32)

    # --- patch_size = 1 (module default) ---
    p = 1
    fan_in = C * p * p
    bound = 1.0 / jnp.sqrt(jnp.float32(fan_in))
    w = jax.random.uniform(kw, (1, C, p, p), dtype=jnp.float32,
                           minval=-bound, maxval=bound)
    b = jax.random.uniform(kb, (1,), dtype=jnp.float32, minval=-bound, maxval=bound)

    out = jax.block_until_ready(dummy_forward(x, w, b, patch_size=p))
    ref = _conv_ref(x, w, b, p)
    assert out.shape == (N, 1, H, W)
    assert jnp.allclose(out, ref, atol=1e-5, rtol=1e-5)

    # --- patch_size = 2 sanity check of the patch path ---
    p2 = 2
    fan_in2 = C * p2 * p2
    bound2 = 1.0 / jnp.sqrt(jnp.float32(fan_in2))
    w2 = jax.random.uniform(kw2, (1, C, p2, p2), dtype=jnp.float32,
                            minval=-bound2, maxval=bound2)
    b2 = jax.random.uniform(kb2, (1,), dtype=jnp.float32, minval=-bound2, maxval=bound2)

    out2 = jax.block_until_ready(dummy_forward(x, w2, b2, patch_size=p2))
    ref2 = _conv_ref(x, w2, b2, p2)
    assert out2.shape == (N, 1, H // p2, W // p2)
    assert jnp.allclose(out2, ref2, atol=1e-5, rtol=1e-5)

    print("KERNEL_OK")
</pallas_src>

<mosaic_0001>
module attributes {stable_mosaic.version = 11 : i64} {
  func.func @_patch_linear_kernel(%arg0: i32, %arg1: i32, %arg2: memref<1x3x256xf32, #tpu.memory_space<vmem>>, %arg3: memref<3xf32, #tpu.memory_space<smem>>, %arg4: memref<1xf32, #tpu.memory_space<smem>>, %arg5: memref<1x1x256xf32, #tpu.memory_space<vmem>>) attributes {dimension_semantics = [#tpu.dimension_semantics<parallel>, #tpu.dimension_semantics<parallel>], iteration_bounds = array<i64: 2, 1>, scalar_prefetch = 0 : i64, scratch_operands = 0 : i64, tpu.core_type = #tpu.core_type<tc>, window_params = [{transform_indices = @transform_0, window_bounds = array<i64: 1, 3, 256>}, {transform_indices = @transform_1, window_bounds = array<i64: 3>}, {transform_indices = @transform_2, window_bounds = array<i64: 1>}, {transform_indices = @transform_3, window_bounds = array<i64: 1, 1, 256>}]} {
    %c0 = arith.constant 0 : index
    %c0_0 = arith.constant 0 : index
    %c0_1 = arith.constant 0 : index
    %0 = vector.load %arg2[%c0, %c0_0, %c0_1] : memref<1x3x256xf32, #tpu.memory_space<vmem>>, vector<1x1x256xf32>
    %1 = vector.shape_cast %0 : vector<1x1x256xf32> to vector<1x256xf32>
    %c0_2 = arith.constant 0 : index
    %2 = memref.load %arg3[%c0_2] : memref<3xf32, #tpu.memory_space<smem>>
    %3 = vector.broadcast %2 : f32 to vector<1x256xf32>
    %4 = arith.mulf %1, %3 : vector<1x256xf32>
    %c0_3 = arith.constant 0 : index
    %c1 = arith.constant 1 : index
    %c0_4 = arith.constant 0 : index
    %5 = vector.load %arg2[%c0_3, %c1, %c0_4] : memref<1x3x256xf32, #tpu.memory_space<vmem>>, vector<1x1x256xf32>
    %6 = vector.shape_cast %5 : vector<1x1x256xf32> to vector<1x256xf32>
    %c1_5 = arith.constant 1 : index
    %7 = memref.load %arg3[%c1_5] : memref<3xf32, #tpu.memory_space<smem>>
    %8 = vector.broadcast %7 : f32 to vector<1x256xf32>
    %9 = arith.mulf %6, %8 : vector<1x256xf32>
    %10 = arith.addf %4, %9 : vector<1x256xf32>
    %c0_6 = arith.constant 0 : index
    %c2 = arith.constant 2 : index
    %c0_7 = arith.constant 0 : index
    %11 = vector.load %arg2[%c0_6, %c2, %c0_7] : memref<1x3x256xf32, #tpu.memory_space<vmem>>, vector<1x1x256xf32>
    %12 = vector.shape_cast %11 : vector<1x1x256xf32> to vector<1x256xf32>
    %c2_8 = arith.constant 2 : index
    %13 = memref.load %arg3[%c2_8] : memref<3xf32, #tpu.memory_space<smem>>
    %14 = vector.broadcast %13 : f32 to vector<1x256xf32>
    %15 = arith.mulf %12, %14 : vector<1x256xf32>
    %16 = arith.addf %10, %15 : vector<1x256xf32>
    %c0_9 = arith.constant 0 : index
    %17 = memref.load %arg4[%c0_9] : memref<1xf32, #tpu.memory_space<smem>>
    %18 = vector.broadcast %17 : f32 to vector<1x256xf32>
    %19 = arith.addf %16, %18 : vector<1x256xf32>
    %c0_10 = arith.constant 0 : index
    %c0_11 = arith.constant 0 : index
    %c0_12 = arith.constant 0 : index
    %20 = vector.load %arg5[%c0_10, %c0_11, %c0_12] : memref<1x1x256xf32, #tpu.memory_space<vmem>>, vector<1x1x256xf32>
    %21 = vector.shape_cast %20 : vector<1x1x256xf32> to vector<1x256xf32>
    %22 = vector.shape_cast %19 : vector<1x256xf32> to vector<1x1x256xf32>
    tpu.vector_store %arg5[%c0_10, %c0_11, %c0_12], %22 {strides = array<i32>} : memref<1x1x256xf32, #tpu.memory_space<vmem>>, vector<1x1x256xf32>,
    return
  }
  func.func @transform_0(%arg0: i32, %arg1: i32) -> (i32, i32, i32) {
    %c0_i32 = arith.constant 0 : i32
    %c0_i32_0 = arith.constant 0 : i32
    return %arg0, %c0_i32, %arg1 : i32, i32, i32
  }
  func.func @transform_1(%arg0: i32, %arg1: i32) -> i32 {
    %c0_i32 = arith.constant 0 : i32
    %c0_i32_0 = arith.constant 0 : i32
    return %c0_i32 : i32
  }
  func.func @transform_2(%arg0: i32, %arg1: i32) -> i32 {
    %c0_i32 = arith.constant 0 : i32
    %c0_i32_0 = arith.constant 0 : i32
    return %c0_i32 : i32
  }
  func.func @transform_3(%arg0: i32, %arg1: i32) -> (i32, i32, i32) {
    %c0_i32 = arith.constant 0 : i32
    %c0_i32_0 = arith.constant 0 : i32
    return %arg0, %c0_i32, %arg1 : i32, i32, i32
  }
}

</mosaic_0001>

<bundles_post_ra>
// kernel: tpu_custom_call.1
= control target key start
LH: loop header
LB: loop body
LE: loop exit
PB: predicated region body
PF: predicated region fallthrough
CT: control target
= control target key end

     0   :  { %s688_s0 = inlined_call_operand.vmem [shape: f32[2,3,256], index: 0, kind: input, shape index: {}]   ;;  %s689_s1 = inlined_call_operand.vmem [shape: f32[3], index: 1, kind: input, shape index: {}]   ;;  %s690_s2 = inlined_call_operand.<no memory space> [shape: f32[1], index: 2, kind: input, shape index: {}]   ;;  %s691_s3 = inlined_call_operand.hbm [shape: f32[2,1,256], index: 3, kind: output, shape index: {}]  }
   0x1   :  { %8 = sst [smem:[#allocation2]] %s690_s2 }
   0x2   :  { %9 = vsyncpa [#allocation5], 0 }
   0x3   :  { %10 = vsyncpa [#allocation4], 0 }
   0x4   :  { %12 = vsyncpa [#allocation4 + $0x1], 0  ;;  %s555_s14 = smov 0   ;;  %s557_s15 = smov 0  }
   0x5   :  { %s559_s16 = smov 0   ;;  %s561_s17 = smov 0  }
   0x6   :  { %s563_s18 = smov 0   ;;  %s565_s19 = smov 0  }
   0x7 LB: > { %s344_s2 = sadd.s32 4294967295, %s528_s19   ;;  %s345_s20 = sadd.s32 4294967294, %s528_s19   ;;  %s528_s19 = sphi %s565_s19, %s18_s19   ;;  %s524_s18 = sphi %s563_s18, %s700_s18   ;;  %s520_s17 = sphi %s561_s17, %s699_s17   ;;  %s516_s16 = sphi %s559_s16, %s698_s16   ;;  %s512_s15 = sphi %s557_s15, %s697_s15   ;;  %s508_s14 = sphi %s555_s14, %s696_s14  }
   0x8   : > { %s30_s21 = sadd.s32 1, %s524_s18  ;;  %s109_s22 = sadd.s32 1, %s516_s16 }
   0x9   : > { %p32_p0 = scmp.ge.s32.totalorder %s30_s21, 2  ;;  %p119_p1 = scmp.ne.s32.totalorder %s516_s16, %s512_s15 }
   0xa   : > { %p120_p2 = scmp.eq.s32.totalorder %s344_s2, 1  ;;  %p125_p3 = scmp.ne.s32.totalorder %s512_s15, %s508_s14 }
   0xb   : > { %s702_s21 = smov (%p32_p0, %s30_s21), 0  ;;  %p126_p5 = scmp.eq.s32.totalorder %s345_s20, 1 }
   0xc   : > { %p595_p4 = por %p120_p2, %p119_p1  ;;  %s104_s24 = ssub.s32 %s524_s18, %s702_s21 }
   0xd   : > { %p346_p6 = scmp.ge.s32.totalorder %s528_s19, 1  ;;  %p107_p7 = scmp.eq.s32.totalorder %s104_s24, 0 }
   0xe   : > { %p602_p8 = por %p126_p5, %p125_p3  ;;  %p133_p9 = scmp.lt.s32.totalorder %s528_s19, 3 }
   0xf   : > { %s608_s26 = scalar_select %p107_p7, %s516_s16, %s109_s22  }
  0x10   : > { %p610_p10 = pnand %p346_p6, %p133_p9  ;;  %p614_p11 = scmp.eq.s32.totalorder %s344_s2, 0 }
  0x11   : > { %s146_s4 = sshll.u32 %s689_s1, 4  ;;  %s147_s4 = int_to_ptr.vmem [resolvable:$true] %s146_s4 }
  0x12   : > { %p371_p12 = pneg %p610_p10  ;;  %s431_s5 = scalar_lea.vmem %s147_s4, 16 }
  0x13   : > { %p432_p0 = scmp.ne.s32.totalorder %s147_s4, %s431_s5  ;;  %p439_p5 = scmp.lt.s32.totalorder %s147_s4, %s147_s4 }
  0x14   : > { %p372_p13 = pnand %p614_p11, %p371_p12  ;;  %p440_p6 = scmp.lt.s32.totalorder %s431_s5, %s431_s5 }
  0x16   : > { %p433_p1 = pneg %p372_p13  ;;  %p441_p7 = por %p440_p6, %p439_p5 }
  0x18   : > { %p434_p2 = pnand %p433_p1, %p432_p0 }
  0x1a   : > { %p435_p3 = pneg %p434_p2 }
  0x1c   : > { %p442_p9 = pnand %p441_p7, %p435_p3 }
  0x1e   : > { %445 = shalt.err (!%p442_p9)
}
  0x1f   : > { %s530_s6 = smov [#allocation3]   ;;  %175 = sbr.rel (%p610_p10) target bundleno = 72 (0x48), region = 32 }
  0x20   : > { %374 = dma.vmem_to_smem (!%p372_p13), %s147_s4, 16, %s530_s6, [#allocation5]  }
  0x26   : > { %499 = dma.done.wait (%p614_p11), [#allocation5], 16  }
  0x27   : > { %501 = vsyncadd (%p614_p11), [#allocation5], 4294967280 }
  0x28   : > { %181 = sfence }
  0x29   : > { %p205_p12 = scmp.lt.s32.totalorder %s520_s17, 1  ;;  %s216_s7 = sld [smem:[#allocation3]]  ;;  %v234_v8 = vlaneseq }
  0x2a   : > { %s201_s8 = sand.u32 1, %s512_s15   ;;  %s355_s9 = sld [smem:[#allocation3 + $0x1]] }
  0x2b   : > { %s206_s10 = scalar_select %p205_p12, %s520_s17, 1  ;;  %vm236_vm0 = vcmp.lt.s32.totalorder %v234_v8, 256 }
  0x2c   : > { %s357_s11 = sld [smem:[#allocation3 + $0x2]]  ;;  %s231_s12 = sld [smem:[#allocation2]] }
  0x2d   : > { %s351_s13 = sshll.u32 %s201_s8, 1  ;;  %s363_s2 = sshll.u32 %s206_s10, 3 }
  0x2e   : > { %s212_s24 = scalar_lea.vmem %s688_s0, %s363_s2  ;;  %s203_s27 = scalar_lea.vmem [#allocation6], %s351_s13 }
  0x2f   : > { %v215_v0 = vld [vmem:[%s212_s24] ss:$4 sm:$0x3]  ;;  %v217_v1 = vstv %s216_s7  ;;  %v354_v2 = vld [vmem:[%s212_s24 + $0x1] ss:$4 sm:$0x3] }
  0x30   : > { %v218_v3 = vmul.f32 %v217_v1, %v215_v0  ;;  %v222_v4 = vstv %s355_s9  ;;  %v356_v5 = vld [vmem:[%s212_s24 + $0x2] ss:$4 sm:$0x3]  ;;  %s256_s28 = sshll.u32 %s203_s27, 4  ;;  %s364_s29 = sshll.u32 %s520_s17, 5  ;;  %s638_s28 = int_to_ptr.vmem [resolvable:$true] %s256_s28 }
  0x31   : > { %v223_v6 = vmul.f32 %v354_v2, %v222_v4  ;;  %s643_s5 = scalar_lea.hbm %s691_s3, %s364_s29  ;;  %s240_s6 = scalar_lea.sflag [#allocation4], %s201_s8 }
  0x32   : > { %v228_v7 = vstv %s357_s11  ;;  %v232_v11 = vstv %s231_s12  ;;  %s446_s7 = scalar_lea.vmem %s638_s28, 32  ;;  %s531_s17 = smov [#allocation6]  }
  0x33   : > { %v224_v9 = vadd.f32 %v223_v6, %v218_v3  ;;  %v229_v10 = vmul.f32 %v356_v5, %v228_v7  ;;  %p447_p10 = scmp.ne.s32.totalorder %s638_s28, %s446_s7  ;;  %s450_s9 = sshll.u32 %s531_s17, 4  ;;  %s451_s9 = int_to_ptr.vmem [resolvable:$false] %s450_s9 }
  0x34   : > { %s452_s10 = scalar_lea.vmem %s451_s9, 64  ;;  %p453_p0 = scmp.lt.s32.totalorder %s638_s28, %s451_s9 }
  0x35   : > { %v230_v12 = vadd.f32 %v229_v10, %v224_v9  ;;  %p448_p11 = pnand %p447_p10, %p595_p4  ;;  %p454_p1 = scmp.lt.s32.totalorder %s452_s10, %s446_s7 }
  0x37   : > { %v233_v13 = vadd.f32 %v232_v11, %v230_v12  ;;  %p449_p13 = pneg %p448_p11  ;;  %p455_p2 = por %p454_p1, %p453_p0 }
  0x39   : > { %238 = vst.msk [vmem:[%s203_s27] sm:$0x3] %vm236_vm0, %v233_v13  ;;  %p456_p3 = pnand %p455_p2, %p449_p13 }
  0x3b   : > { %459 = shalt.err (!%p456_p3)
}
  0x3c   : > { %s460_s8 = scalar_lea.hbm %s643_s5, 32  ;;  %s464_s13 = scalar_lea.hbm %s691_s3, 64 }
  0x3d   : > { %p461_p5 = scmp.ne.s32.totalorder %s643_s5, %s460_s8  ;;  %p465_p9 = scmp.lt.u32.totalorder %s643_s5, %s691_s3 }
  0x3e   : > { %p466_p12 = scmp.lt.u32.totalorder %s464_s13, %s460_s8  ;;  %p468_p11 = scmp.lt.u32.totalorder %s460_s8, %s643_s5 }
  0x3f   : > { %p462_p6 = pnand %p461_p5, %p595_p4 }
  0x40   : > { %p467_p10 = por %p466_p12, %p465_p9 }
  0x41   : > { %p463_p7 = pneg %p462_p6 }
  0x42   : > { %p469_p13 = por %p468_p11, %p467_p10 }
  0x44   : > { %p470_p0 = pnand %p469_p13, %p463_p7 }
  0x46   : > { %473 = shalt.err (!%p470_p0)
}
  0x47   : > { %369 = dma.vmem_to_hbm [thread:$0]  (%p595_p4), %s638_s28, 32, %s643_s5, %s240_s6  }
  0x48 PF: > { %p381_p1 = scmp.ge.s32.totalorder %s528_s19, 2  ;;  %s268_s22 = sand.u32 1, %s508_s14  }
  0x49   : > { %s269_s24 = scalar_lea.sflag [#allocation4], %s268_s22 }
  0x4a   : > { %p376_p2 = pnand %p381_p1, %p602_p8 }
  0x4c   : > { %503 = dma.done.wait (!%p376_p2), %s269_s24, 32  }
  0x4d   : > { %505 = vsyncadd (!%p376_p2), %s269_s24, 4294967264  ;;  %s18_s19 = sadd.s32 1, %s528_s19   ;;  %s696_s14 = smov %s512_s15 }
  0x4e   : > { %p15_p3 = scmp.ge.s32.totalorder %s18_s19, 4   ;;  %s697_s15 = smov %s516_s16 }
  0x4f   : > { %s698_s16 = smov %s608_s26  ;;  %s699_s17 = smov %s524_s18 }
  0x50   : > { %s700_s18 = smov %s702_s21  ;;  %17 = sbr.rel (!%p15_p3) target bundleno = 7 (0x7), region = 74 }
  0x57   :  { %274 = vsyncpa [#allocation4], 1 }
  0x58   :  { %276 = vsyncpa [#allocation4 + $0x1], 1 }
  0x59   :  { %277 = vsyncpa [#allocation5], 1 }
  0x5a   :  { %279 = vsyncpa [#allocation5 + $0x1], 1 }

</bundles_post_ra>
